<compile_context>
chip_gen: v5e
topology: v5e:2x2
jax: 0.10.0
libtpu: 0.0.40
codegen_flags: <defaults>
</compile_context>

<pallas_src>
import functools

import jax
import jax.numpy as jnp
from jax.experimental import pallas as pl
from jax.experimental.pallas import tpu as pltpu

IN_FEATURES = 512
HIDDEN = 128
LANE = 128           # TPU lane width — class dim padded up to a multiple of this
SUBLANE = 16         # bf16 sublane packing — batch tiles are multiples of this


def _round_up(x, m):
    return ((x + m - 1) // m) * m


def _mlp_kernel(x_ref, w1_ref, b1_ref, w2_ref, b2_ref, o_ref):
    # First linear: [tb, 512]bf16 @ [512, 128]bf16 -> f32 accumulator (MXU).
    h = jnp.dot(x_ref[...], w1_ref[...], preferred_element_type=jnp.float32)
    # Bias + ReLU on the f32 accumulator (VPU).
    h = jnp.maximum(h + b1_ref[...], 0.0)
    # Dropout(0.5): identity at inference.
    # Second linear: [tb, 128]bf16 @ [128, c_pad]bf16 -> f32 (MXU).
    out = jnp.dot(h.astype(w2_ref.dtype), w2_ref[...],
                  preferred_element_type=jnp.float32)
    out = out + b2_ref[...]
    # Lane-dense (c_pad multiple of 128) full-width store.
    o_ref[...] = out.astype(o_ref.dtype)


def prepare_params(w1, b1, w2, b2):
    """One-time parameter prep — call at load time, NOT inside the forward pass.

    w1: [512, 128], b1: [1, 128] or [128]
    w2: [128, C],   b2: [1, C]   or [C]
    Returns bf16 weights with the class dim zero-padded to a lane-dense width.
    """
    C = w2.shape[1]
    c_pad = _round_up(max(C, LANE), LANE)
    w1_b = w1.astype(jnp.bfloat16)
    b1_f = jnp.asarray(b1, jnp.float32).reshape(1, HIDDEN)
    w2_p = jnp.zeros((HIDDEN, c_pad), jnp.bfloat16).at[:, :C].set(
        w2.astype(jnp.bfloat16))
    b2_p = jnp.zeros((1, c_pad), jnp.float32).at[:, :C].set(
        jnp.asarray(b2, jnp.float32).reshape(1, C))
    return (w1_b, b1_f, w2_p, b2_p)


def classifier_forward(x, params, num_classes, *, tile_b=2048, training=False,
                       out_dtype=jnp.float32, return_padded=False):
    """Fused 2-layer MLP forward as a single batch-tiled Pallas TPU kernel.

    x:      [B, 512]  (bf16 preferred; f32 is cast once, no padded copy is made)
    params: output of prepare_params(...)
    returns [B, num_classes] (or the [B, c_pad] lane-dense slab if return_padded).
    """
    if training:
        # TODO(synk): implement stochastic dropout masking for training mode.
        raise NotImplementedError("training-mode dropout not implemented")

    w1_b, b1_f, w2_p, b2_p = params
    c_pad = w2_p.shape[1]
    B = x.shape[0]

    # No padded x copy — just a dtype cast if the producer didn't give bf16.
    x_b = x if x.dtype == jnp.bfloat16 else x.astype(jnp.bfloat16)

    # --- batch tile selection -------------------------------------------------
    if B <= 2 * SUBLANE:
        tb = B                         # tiny batch: one full-extent block (always legal)
    else:
        tb = min(tile_b, B)
        # Keep >=2 grid steps so ("parallel",) can shard across both v7x TCs.
        tb = min(tb, _round_up(pl.cdiv(B, 2), SUBLANE))
        tb = _round_up(tb, SUBLANE)
    grid = (pl.cdiv(B, tb),)

    out_isize = jnp.dtype(out_dtype).itemsize

    # --- VMEM budget: only raise the scoped limit if we'd exceed v5e's 16 MiB ---
    vmem_need = (2 * tb * IN_FEATURES * 2          # double-buffered x (bf16)
                 + 2 * tb * c_pad * out_isize      # double-buffered out
                 + IN_FEATURES * HIDDEN * 2        # w1 (bf16)
                 + HIDDEN * c_pad * 2              # w2 (bf16)
                 + (HIDDEN + c_pad) * 4)           # biases (f32)
    cp_kwargs = dict(dimension_semantics=("parallel",))
    if vmem_need > (12 << 20):
        cp_kwargs["vmem_limit_bytes"] = int(min(64 << 20, 2 * vmem_need))
    compiler_params = pltpu.CompilerParams(**cp_kwargs)

    flops = 2 * B * (IN_FEATURES * HIDDEN + HIDDEN * c_pad)
    bytes_accessed = (B * IN_FEATURES * 2
                      + IN_FEATURES * HIDDEN * 2 + HIDDEN * c_pad * 2
                      + (HIDDEN + c_pad) * 4
                      + B * c_pad * out_isize)

    out_p = pl.pallas_call(
        _mlp_kernel,
        out_shape=jax.ShapeDtypeStruct((B, c_pad), out_dtype),
        grid=grid,
        in_specs=[
            # x tile streams over the batch grid (auto double-buffered).
            pl.BlockSpec((tb, IN_FEATURES), lambda i: (i, 0)),
            # Weights/biases: same block every step -> VMEM-resident, no re-DMA.
            pl.BlockSpec((IN_FEATURES, HIDDEN), lambda i: (0, 0)),
            pl.BlockSpec((1, HIDDEN), lambda i: (0, 0)),
            pl.BlockSpec((HIDDEN, c_pad), lambda i: (0, 0)),
            pl.BlockSpec((1, c_pad), lambda i: (0, 0)),
        ],
        out_specs=pl.BlockSpec((tb, c_pad), lambda i: (i, 0)),
        compiler_params=compiler_params,
        cost_estimate=pl.CostEstimate(
            flops=flops, transcendentals=0, bytes_accessed=bytes_accessed),
    )(x_b, w1_b, b1_f, w2_p, b2_p)

    if return_padded:
        # Let the consumer (argmax / softmax-CE) fuse the [:, :C] slice.
        return out_p
    return out_p[:, :num_classes]


def init_params(key, num_classes):
    """Parameter init matching the module's shapes.

    PyTorch stores Linear weights as [out, in]; we store the transpose
    [in, out] so the kernel can do x @ W directly.
    """
    k1, k2, k3, k4 = jax.random.split(key, 4)
    scale1 = 1.0 / jnp.sqrt(IN_FEATURES)
    scale2 = 1.0 / jnp.sqrt(HIDDEN)
    w1 = jax.random.uniform(k1, (IN_FEATURES, HIDDEN), jnp.float32, -scale1, scale1)
    b1 = jax.random.uniform(k2, (1, HIDDEN), jnp.float32, -scale1, scale1)
    w2 = jax.random.uniform(k3, (HIDDEN, num_classes), jnp.float32, -scale2, scale2)
    b2 = jax.random.uniform(k4, (1, num_classes), jnp.float32, -scale2, scale2)
    return w1, b1, w2, b2


if __name__ == "__main__":
    num_classes = 10
    batch = 8

    key = jax.random.PRNGKey(0)
    kx, kp = jax.random.split(key)
    x = jax.random.normal(kx, (batch, IN_FEATURES), dtype=jnp.float32)
    w1, b1, w2, b2 = init_params(kp, num_classes)

    # One-time parameter prep (outside the per-call forward path).
    params = prepare_params(w1, b1, w2, b2)

    fwd = jax.jit(functools.partial(classifier_forward, num_classes=num_classes))
    out = fwd(x, params)
    out = jax.block_until_ready(out)

    # Pure-JAX reference using the same bf16-input / f32-accumulate numerics
    # (eval-mode dropout == identity).
    h_ref = jnp.dot(x.astype(jnp.bfloat16), w1.astype(jnp.bfloat16),
                    preferred_element_type=jnp.float32)
    h_ref = jnp.maximum(h_ref + b1, 0.0)
    ref = jnp.dot(h_ref.astype(jnp.bfloat16), w2.astype(jnp.bfloat16),
                  preferred_element_type=jnp.float32) + b2

    assert out.shape == (batch, num_classes), out.shape
    assert jnp.allclose(out, ref, atol=2e-2, rtol=2e-2), (
        float(jnp.max(jnp.abs(out - ref))))

    print("KERNEL_OK")
</pallas_src>

<mosaic_0001>
module attributes {stable_mosaic.version = 11 : i64} {
  func.func @_mlp_kernel(%arg0: i32, %arg1: memref<8x512xbf16, #tpu.memory_space<vmem>>, %arg2: memref<512x128xbf16, #tpu.memory_space<vmem>>, %arg3: memref<1x128xf32, #tpu.memory_space<vmem>>, %arg4: memref<128x128xbf16, #tpu.memory_space<vmem>>, %arg5: memref<1x128xf32, #tpu.memory_space<vmem>>, %arg6: memref<8x128xf32, #tpu.memory_space<vmem>>) attributes {dimension_semantics = [#tpu.dimension_semantics<parallel>], iteration_bounds = array<i64: 1>, scalar_prefetch = 0 : i64, scratch_operands = 0 : i64, tpu.core_type = #tpu.core_type<tc>, window_params = [{transform_indices = @transform_0, window_bounds = array<i64: 8, 512>}, {pipeline_mode = #tpu.pipeline_mode<synchronous>, transform_indices = @transform_1, window_bounds = array<i64: 512, 128>}, {pipeline_mode = #tpu.pipeline_mode<synchronous>, transform_indices = @transform_2, window_bounds = array<i64: 1, 128>}, {pipeline_mode = #tpu.pipeline_mode<synchronous>, transform_indices = @transform_3, window_bounds = array<i64: 128, 128>}, {pipeline_mode = #tpu.pipeline_mode<synchronous>, transform_indices = @transform_4, window_bounds = array<i64: 1, 128>}, {transform_indices = @transform_5, window_bounds = array<i64: 8, 128>}]} {
    %c0 = arith.constant 0 : index
    %c0_0 = arith.constant 0 : index
    %0 = vector.load %arg1[%c0, %c0_0] : memref<8x512xbf16, #tpu.memory_space<vmem>>, vector<8x512xbf16>
    %c0_1 = arith.constant 0 : index
    %c0_2 = arith.constant 0 : index
    %1 = vector.load %arg2[%c0_1, %c0_2] : memref<512x128xbf16, #tpu.memory_space<vmem>>, vector<512x128xbf16>
    %cst = arith.constant dense<0.000000e+00> : vector<8x128xf32>
    %2 = tpu.matmul %0, %1, %cst {dimension_numbers = #tpu.dot_dimension_numbers<[1], [0], [0], [1], [0, 0, 1, 1], [], []>} : vector<8x512xbf16>, vector<512x128xbf16>, vector<8x128xf32> -> vector<8x128xf32>
    %c0_3 = arith.constant 0 : index
    %c0_4 = arith.constant 0 : index
    %3 = vector.load %arg3[%c0_3, %c0_4] : memref<1x128xf32, #tpu.memory_space<vmem>>, vector<1x128xf32>
    %4 = vector.broadcast %3 : vector<1x128xf32> to vector<8x128xf32>
    %5 = arith.addf %2, %4 : vector<8x128xf32>
    %cst_5 = arith.constant 0.000000e+00 : f32
    %6 = vector.broadcast %cst_5 : f32 to vector<8x128xf32>
    %7 = arith.maximumf %5, %6 : vector<8x128xf32>
    %8 = arith.truncf %7 : vector<8x128xf32> to vector<8x128xbf16>
    %c0_6 = arith.constant 0 : index
    %c0_7 = arith.constant 0 : index
    %9 = vector.load %arg4[%c0_6, %c0_7] : memref<128x128xbf16, #tpu.memory_space<vmem>>, vector<128x128xbf16>
    %cst_8 = arith.constant dense<0.000000e+00> : vector<8x128xf32>
    %10 = tpu.matmul %8, %9, %cst_8 {dimension_numbers = #tpu.dot_dimension_numbers<[1], [0], [0], [1], [0, 0, 1, 1], [], []>} : vector<8x128xbf16>, vector<128x128xbf16>, vector<8x128xf32> -> vector<8x128xf32>
    %c0_9 = arith.constant 0 : index
    %c0_10 = arith.constant 0 : index
    %11 = vector.load %arg5[%c0_9, %c0_10] : memref<1x128xf32, #tpu.memory_space<vmem>>, vector<1x128xf32>
    %12 = vector.broadcast %11 : vector<1x128xf32> to vector<8x128xf32>
    %13 = arith.addf %10, %12 : vector<8x128xf32>
    %c0_11 = arith.constant 0 : index
    %c0_12 = arith.constant 0 : index
    %14 = vector.load %arg6[%c0_11, %c0_12] : memref<8x128xf32, #tpu.memory_space<vmem>>, vector<8x128xf32>
    tpu.vector_store %arg6[%c0_11, %c0_12], %13 {strides = array<i32>} : memref<8x128xf32, #tpu.memory_space<vmem>>, vector<8x128xf32>,
    return
  }
  func.func @transform_0(%arg0: i32) -> (i32, i32) {
    %c0_i32 = arith.constant 0 : i32
    %c0_i32_0 = arith.constant 0 : i32
    return %arg0, %c0_i32 : i32, i32
  }
  func.func @transform_1(%arg0: i32) -> (i32, i32) {
    %c0_i32 = arith.constant 0 : i32
    %c0_i32_0 = arith.constant 0 : i32
    %c0_i32_1 = arith.constant 0 : i32
    return %c0_i32, %c0_i32_0 : i32, i32
  }
  func.func @transform_2(%arg0: i32) -> (i32, i32) {
    %c0_i32 = arith.constant 0 : i32
    %c0_i32_0 = arith.constant 0 : i32
    %c0_i32_1 = arith.constant 0 : i32
    return %c0_i32, %c0_i32_0 : i32, i32
  }
  func.func @transform_3(%arg0: i32) -> (i32, i32) {
    %c0_i32 = arith.constant 0 : i32
    %c0_i32_0 = arith.constant 0 : i32
    %c0_i32_1 = arith.constant 0 : i32
    return %c0_i32, %c0_i32_0 : i32, i32
  }
  func.func @transform_4(%arg0: i32) -> (i32, i32) {
    %c0_i32 = arith.constant 0 : i32
    %c0_i32_0 = arith.constant 0 : i32
    %c0_i32_1 = arith.constant 0 : i32
    return %c0_i32, %c0_i32_0 : i32, i32
  }
  func.func @transform_5(%arg0: i32) -> (i32, i32) {
    %c0_i32 = arith.constant 0 : i32
    %c0_i32_0 = arith.constant 0 : i32
    return %arg0, %c0_i32 : i32, i32
  }
}

</mosaic_0001>

<bundles_post_ra>
// kernel: classifier_forward.1
= control target key start
LH: loop header
LB: loop body
LE: loop exit
PB: predicated region body
PF: predicated region fallthrough
CT: control target
= control target key end

     0   :  { %10 = vsyncpa [#allocation3], 0  ;;  %s824_s0 = inlined_call_operand.vmem [shape: bf16[8,512], index: 0, kind: input, shape index: {}]   ;;  %s825_s1 = inlined_call_operand.hbm [shape: bf16[512,128], index: 1, kind: input, shape index: {}]   ;;  %s826_s2 = inlined_call_operand.vmem [shape: f32[1,128], index: 2, kind: input, shape index: {}]   ;;  %s827_s3 = inlined_call_operand.hbm [shape: bf16[128,128], index: 3, kind: input, shape index: {}]   ;;  %s828_s4 = inlined_call_operand.vmem [shape: f32[1,128], index: 4, kind: input, shape index: {}]   ;;  %s829_s5 = inlined_call_operand.hbm [shape: f32[8,128], index: 5, kind: output, shape index: {}]  }
   0x1   :  { %11 = vsyncpa [#allocation6], 0 }
   0x2   :  { %12 = vsyncpa [#allocation4], 0  ;;  %s19_s20 = sshll.u32 %s825_s1, 4  ;;  %s768_s21 = smov [#allocation2]   ;;  %s20_s20 = int_to_ptr.hbm [resolvable:$true] %s19_s20 }
   0x3   :  { %s21_s22 = sshll.u32 %s768_s21, 4  ;;  %s34_s25 = sshll.u32 %s827_s3, 4  ;;  %s22_s22 = int_to_ptr.vmem [resolvable:$true] %s21_s22  ;;  %s35_s25 = int_to_ptr.hbm [resolvable:$true] %s34_s25 }
   0x4   :  { %s769_s26 = smov 64   ;;  %s770_s27 = smov 4  }
   0x5   :  { %27 = dma.hbm_to_vmem [thread:$0]  %s20_s20, 4096, %s22_s22, [#allocation3], %s769_s26, %s769_s26, %s770_s27  }
   0x6   :  { %s771_s28 = smov [#allocation5]  }
   0x7   :  { %s36_s29 = sshll.u32 %s771_s28, 4  ;;  %s37_s29 = int_to_ptr.vmem [resolvable:$true] %s36_s29 }
   0x8   :  { %42 = dma.hbm_to_vmem [thread:$0]  %s35_s25, 1024, %s37_s29, [#allocation6], %s769_s26, %s769_s26, %s770_s27  }
   0x9   :  { %762 = dma.done.wait [#allocation3], 4096  }
   0xa   :  { %763 = vsyncadd [#allocation3], 4294963200 }
   0xb   :  { %764 = dma.done.wait [#allocation6], 1024  }
   0xc   :  { %765 = vsyncadd [#allocation6], 4294966272  ;;  %v650_v0 = vld [vmem:[#allocation2 + $0x38] sm:$0xff]  ;;  %v649_v4 = vld [vmem:[#allocation2 + $0x30] sm:$0xff]  ;;  %s472_s13 = sshll.u32 %s829_s5, 4  ;;  %s473_s13 = int_to_ptr.hbm [resolvable:$true] %s472_s13 }
   0xd   :  { %v658_v1 = vld [vmem:[#allocation2 + $0x78] sm:$0xff]  ;;  %329 = vmatpush.bf16.msra.mxu0 %v650_v0  ;;  %v657_v5 = vld [vmem:[#allocation2 + $0x70] sm:$0xff]  ;;  %v648_v8 = vld [vmem:[#allocation2 + $0x28] sm:$0xff] }
   0xe   :  { %v666_v2 = vld [vmem:[#allocation2 + $0xb8] sm:$0xff]  ;;  %342 = vmatpush.bf16.msra.mxu1 %v658_v1  ;;  %v665_v6 = vld [vmem:[#allocation2 + $0xb0] sm:$0xff]  ;;  %v656_v9 = vld [vmem:[#allocation2 + $0x68] sm:$0xff] }
   0xf   :  { %v674_v3 = vld [vmem:[#allocation2 + $0xf8] sm:$0xff]  ;;  %355 = vmatpush.bf16.msra.mxu2 %v666_v2  ;;  %v673_v7 = vld [vmem:[#allocation2 + $0xf0] sm:$0xff]  ;;  %v664_v10 = vld [vmem:[#allocation2 + $0xa8] sm:$0xff] }
  0x10   :  { %368 = vmatpush.bf16.msra.mxu3 %v674_v3  ;;  %v672_v11 = vld [vmem:[#allocation2 + $0xe8] sm:$0xff]  ;;  %v647_v12 = vld [vmem:[#allocation2 + $0x20] sm:$0xff]  ;;  %v646_v16 = vld [vmem:[#allocation2 + $0x18] sm:$0xff] }
  0x11   :  { %330 = vmatpush.bf16.msra.mxu0 %v649_v4  ;;  %v655_v13 = vld [vmem:[#allocation2 + $0x60] sm:$0xff]  ;;  %v654_v17 = vld [vmem:[#allocation2 + $0x58] sm:$0xff]  ;;  %v645_v20 = vld [vmem:[#allocation2 + $0x10] sm:$0xff] }
  0x12   :  { %343 = vmatpush.bf16.msra.mxu1 %v657_v5  ;;  %v663_v14 = vld [vmem:[#allocation2 + $0xa0] sm:$0xff]  ;;  %v662_v18 = vld [vmem:[#allocation2 + $0x98] sm:$0xff]  ;;  %v653_v21 = vld [vmem:[#allocation2 + $0x50] sm:$0xff] }
  0x13   :  { %356 = vmatpush.bf16.msra.mxu2 %v665_v6  ;;  %v671_v15 = vld [vmem:[#allocation2 + $0xe0] sm:$0xff]  ;;  %v670_v19 = vld [vmem:[#allocation2 + $0xd8] sm:$0xff]  ;;  %v661_v22 = vld [vmem:[#allocation2 + $0x90] sm:$0xff] }
  0x14   :  { %369 = vmatpush.bf16.msra.mxu3 %v673_v7  ;;  %v669_v23 = vld [vmem:[#allocation2 + $0xd0] sm:$0xff]  ;;  %v644_v24 = vld [vmem:[#allocation2 + $0x8] sm:$0xff]  ;;  %v53_v26 = vld [vmem:[%s824_s0] sm:$0xff] }
  0x15   :  { %331 = vmatpush.bf16.msra.mxu0 %v648_v8  ;;  %v652_v25 = vld [vmem:[#allocation2 + $0x48] sm:$0xff]  ;;  %v125_v30 = vunpack.c.l.b16 %v53_v26  ;;  %v126_v31 = vunpack.c.h.b16 %v53_v26  ;;  %v643_v32 = vld [vmem:[#allocation2] sm:$0xff]  ;;  %v682_v38 = vld [vmem:[#allocation5 + $0x38] sm:$0xff] }
  0x16   :  { %344 = vmatpush.bf16.msra.mxu1 %v656_v9  ;;  %v660_v27 = vld [vmem:[#allocation2 + $0x88] sm:$0xff]  ;;  %v651_v33 = vld [vmem:[#allocation2 + $0x40] sm:$0xff]  ;;  %v681_v43 = vld [vmem:[#allocation5 + $0x30] sm:$0xff] }
  0x17   :  { %357 = vmatpush.bf16.msra.mxu2 %v664_v10  ;;  %v668_v28 = vld [vmem:[#allocation2 + $0xc8] sm:$0xff]  ;;  %v659_v36 = vld [vmem:[#allocation2 + $0x80] sm:$0xff]  ;;  %v129_v39 = vpack.c.b16 %v125_v30, %v125_v30  ;;  %v130_v40 = vpack.c.b16 %v126_v31, %v126_v31  ;;  %v678_v46 = vld [vmem:[#allocation5 + $0x18] sm:$0xff] }
  0x18   :  { %370 = vmatpush.bf16.msra.mxu3 %v672_v11  ;;  %v54_v29 = vld [vmem:[%s824_s0 + $0x8] sm:$0xff]  ;;  %v667_v37 = vld [vmem:[#allocation2 + $0xc0] sm:$0xff]  ;;  %v677_v47 = vld [vmem:[#allocation5 + $0x10] sm:$0xff] }
  0x19   :  { %332 = vmatpush.bf16.msra.mxu0 %v647_v12  ;;  %v127_v34 = vunpack.c.l.b16 %v54_v29  ;;  %v128_v35 = vunpack.c.h.b16 %v54_v29  ;;  %v680_v44 = vld [vmem:[#allocation5 + $0x28] sm:$0xff]  ;;  %v679_v45 = vld [vmem:[#allocation5 + $0x20] sm:$0xff] }
  0x1a   :  { %345 = vmatpush.bf16.msra.mxu1 %v655_v13  ;;  %v676_v48 = vld [vmem:[#allocation5 + $0x8] sm:$0xff]  ;;  %v675_v49 = vld [vmem:[#allocation5] sm:$0xff] }
  0x1b   :  { %358 = vmatpush.bf16.msra.mxu2 %v663_v14  ;;  %v131_v41 = vpack.c.b16 %v127_v34, %v127_v34  ;;  %v132_v42 = vpack.c.b16 %v128_v35, %v128_v35  ;;  %v688_v50 = vld [vmem:[%s826_s2] ss:$0 sm:$0xff]  ;;  %s772_s2 = smov [#allocation7]  }
  0x1c   :  { %371 = vmatpush.bf16.msra.mxu3 %v671_v15  ;;  %v689_v1 = vld [vmem:[%s828_s4] ss:$0 sm:$0xff]  ;;  %s470_s10 = sshll.u32 %s772_s2, 4  ;;  %s471_s10 = int_to_ptr.vmem [resolvable:$true] %s470_s10 }
  0x1d   :  { %333 = vmatpush.bf16.msra.mxu0 %v646_v16 }
  0x1e   :  { %346 = vmatpush.bf16.msra.mxu1 %v654_v17 }
  0x1f   :  { %359 = vmatpush.bf16.msra.mxu2 %v662_v18 }
  0x20   :  { %372 = vmatpush.bf16.msra.mxu3 %v670_v19 }
  0x21   :  { %334 = vmatpush.bf16.msra.mxu0 %v645_v20 }
  0x22   :  { %347 = vmatpush.bf16.msra.mxu1 %v653_v21 }
  0x23   :  { %360 = vmatpush.bf16.msra.mxu2 %v661_v22 }
  0x24   :  { %373 = vmatpush.bf16.msra.mxu3 %v669_v23 }
  0x25   :  { %335 = vmatpush.bf16.msra.mxu0 %v644_v24 }
  0x26   :  { %348 = vmatpush.bf16.msra.mxu1 %v652_v25 }
  0x27   :  { %361 = vmatpush.bf16.msra.mxu2 %v660_v27 }
  0x28   :  { %374 = vmatpush.bf16.msra.mxu3 %v668_v28 }
  0x29   :  { %336 = vmatpush.bf16.msra.mxu0 %v643_v32 }
  0x2a   :  { %349 = vmatpush.bf16.msra.mxu1 %v651_v33 }
  0x2b   :  { %362 = vmatpush.bf16.msra.mxu2 %v659_v36 }
  0x2c   :  { %375 = vmatpush.bf16.msra.mxu3 %v667_v37  ;;  %337 = vmatmul.bf16.vlgmr.msra.gmra.mxu0 %v129_v39 }
  0x2d   :  { %451 = vmatpush.bf16.msrb.mxu0 %v682_v38  ;;  %350 = vmatmul.bf16.vlgmr.msra.gmra.mxu1 %v130_v40 }
  0x2e   :  { %363 = vmatmul.bf16.vlgmr.msra.gmra.mxu2 %v131_v41 }
  0x2f   :  { %376 = vmatmul.bf16.vlgmr.msra.gmra.mxu3 %v132_v42 }
  0x31   :  { %452 = vmatpush.bf16.msrb.mxu0 %v681_v43 }
  0x35   :  { %453 = vmatpush.bf16.msrb.mxu0 %v680_v44 }
  0x39   :  { %454 = vmatpush.bf16.msrb.mxu0 %v679_v45 }
  0x3d   :  { %455 = vmatpush.bf16.msrb.mxu0 %v678_v46 }
  0x41   :  { %456 = vmatpush.bf16.msrb.mxu0 %v677_v47 }
  0x45   :  { %457 = vmatpush.bf16.msrb.mxu0 %v676_v48 }
  0x49   :  { %458 = vmatpush.bf16.msrb.mxu0 %v675_v49 }
  0xa9   :  { %v338_v51 = vpop.f32.mrf.mxu0 }
  0xaa   :  { %v351_v52 = vpop.f32.mrf.mxu1  ;;  %v339_v53 = vadd.f32 %v688_v50, %v338_v51 }
  0xac   :  { %v352_v54 = vadd.f32 %v351_v52, %v339_v53 }
  0xb1   :  { %v364_v55 = vpop.f32.mrf.mxu2  ;;  %v340_v58 = vpop.f32.mrf.mxu0 }
  0xb2   :  { %v377_v56 = vpop.f32.mrf.mxu3  ;;  %v365_v57 = vadd.f32 %v364_v55, %v352_v54  ;;  %v353_v59 = vpop.f32.mrf.mxu1 }
  0xb4   :  { %v378_v60 = vadd.f32 %v377_v56, %v365_v57 }
  0xb6   :  { %v381_v61 = vmax.f32 %v378_v60, 0.0 }
  0xb8   :  { %v382_v62 = vpack.c.bf16 %v381_v61, %v381_v61 }
  0xb9   :  { %v366_v63 = vpop.f32.mrf.mxu2 }
  0xba   :  { %v379_v0 = vpop.f32.mrf.mxu3  ;;  %459 = vmatmul.bf16.vlgmr.msrb.gmra.mxu0 %v382_v62 }
 0x137   :  { %v460_v2 = vpop.f32.mrf.mxu0 }
 0x138   :  { %v461_v3 = vadd.f32 %v689_v1, %v460_v2 }
 0x13a   :  { %464 = vst [vmem:[#allocation7] sm:$0xff] %v461_v3 }
 0x13b   :  { %475 = dma.vmem_to_hbm [thread:$0]  %s471_s10, 128, %s473_s13, [#allocation4]  }
 0x13f   :  { %v462_v4 = vpop.f32.mrf.mxu0 }
 0x140   :  { %766 = dma.done.wait [#allocation4], 128  }
 0x141   :  { %767 = vsyncadd [#allocation4], 4294967168 }
 0x142   :  { %480 = vsyncpa [#allocation3], 1 }
 0x143   :  { %481 = vsyncpa [#allocation6], 1 }
 0x144   :  { %482 = vsyncpa [#allocation4], 1 }

</bundles_post_ra>
